<compile_context>
chip_gen: v5e
topology: v5e:2x2
jax: 0.10.0
libtpu: 0.0.40
codegen_flags: <defaults>
</compile_context>

<pallas_src>
import jax
import jax.numpy as jnp
from jax.experimental import pallas as pl
from jax.experimental.pallas import tpu as pltpu


# ---------------------------------------------------------------------------
# Kernel: one (TM, F) batch tile per grid step.  Weights / shifts are pinned
# (constant block index) so Pallas keeps them resident across the whole grid.
# ---------------------------------------------------------------------------
def _linear_block_kernel(x_ref, w1_ref, t1_ref, w2_ref, t2_ref, out_ref):
    x = x_ref[...]                                   # (TM, F) f32

    # --- l1 (+ folded bn1 scale) + bn1 shift + relu -------------------------
    h = jnp.dot(x.astype(jnp.bfloat16), w1_ref[...],
                preferred_element_type=jnp.float32)  # MXU, f32 accumulate
    h = jnp.maximum(h + t1_ref[...], 0.0)            # f32 epilogue (VPU)
    # Dropout: identity in eval mode.

    # --- l2 (+ folded bn2 scale) + bn2 shift + relu -------------------------
    y = jnp.dot(h.astype(jnp.bfloat16), w2_ref[...],
                preferred_element_type=jnp.float32)
    y = jnp.maximum(y + t2_ref[...], 0.0)
    # Dropout: identity in eval mode.

    # --- residual ------------------------------------------------------------
    out_ref[...] = (x + y).astype(out_ref.dtype)


# ---------------------------------------------------------------------------
# Helpers
# ---------------------------------------------------------------------------
def _round_up(v, m):
    return -(-v // m) * m


def _vmem_budget_bytes():
    """Generation-aware usable-VMEM budget."""
    try:
        cap = int(pltpu.get_tpu_info().vmem_capacity_bytes)
    except Exception:
        cap = 64 << 20                       # conservative: v7x per-TC VMEM
    if cap <= (64 << 20):
        return 40 << 20                      # v7x: leave Mosaic-scratch headroom
    return min(int(cap * 0.78), 100 << 20)   # 128 MiB parts (v5e / v6e)


def prepare_params(params, eps=1e-5):
    """Fold Linear bias + eval-mode BatchNorm into bf16 weights + f32 shifts.

    Done ONCE, outside the per-call hot path (hoisted per review):
      bn(z) = (z - mean)/sqrt(var+eps)*gamma + beta,  z = x @ Wt + b
            = x @ (Wt * s) + ((b - mean)*s + beta),   s = gamma/sqrt(var+eps)
    Note: bf16 weights (f32 MXU accumulation) trade a little precision for
    half the bandwidth/VMEM; keep f32 weights if strict parity is required.
    """
    def fold(w_t, b, gamma, beta, mean, var):
        s = gamma / jnp.sqrt(var + eps)                      # (F,)
        t = (b - mean) * s + beta                            # (F,)
        return ((w_t * s[None, :]).astype(jnp.bfloat16),     # (F_in, F_out) bf16
                t.reshape(1, -1).astype(jnp.float32))

    w1f, t1 = fold(params["w1t"], params["b1"], params["g1"], params["beta1"],
                   params["m1"], params["v1"])
    w2f, t2 = fold(params["w2t"], params["b2"], params["g2"], params["beta2"],
                   params["m2"], params["v2"])
    return {"w1f": w1f, "t1": t1, "w2f": w2f, "t2": t2}


def _launch(x, folded, out_dtype, single_buffer_pinned):
    N, F = x.shape
    assert F % 128 == 0, "feature dim must be a multiple of 128 (lane width)"

    budget = _vmem_budget_bytes()
    bf16_b, f32_b = 2, 4
    w_copies = 1 if single_buffer_pinned else 2
    resident = w_copies * (2 * F * F * bf16_b + 2 * 1 * F * f32_b)
    # TODO(synk): for F where the folded weights no longer fit the budget
    # (F ~3.2k bf16 on v7x with single-buffered weights), add a K-tiling grid
    # axis ("arbitrary") with an f32 VMEM accumulator (init/finalize via
    # pl.when) instead of full weight residency.
    assert resident + (4 << 20) <= budget, (
        "weights too large for full VMEM residency; K-tiling not implemented")

    # --- batch tile: biggest TM that fits the remaining VMEM.  x + out tiles
    # are f32 and double-buffered -> 16*TM*F bytes per row of budget.  Cap at
    # 2048 rows; keep >= 2 grid steps when N >= 256 so v7x megacore can shard.
    tm_budget = max(8, ((budget - resident - (2 << 20)) // (16 * F)) // 8 * 8)
    tm_cap = min(tm_budget, 2048)
    if N < 256:
        TM = min(_round_up(N, 8), tm_cap)       # tiny batch: one (or few) tiles
    else:
        n_tiles = max(2, -(-N // tm_cap))       # >= 2 tiles for v7x's 2 TCs
        TM = min(_round_up(-(-N // n_tiles), 8), tm_cap)
    n_tiles = -(-N // TM)
    N_pad = n_tiles * TM
    x_p = jnp.pad(x, ((0, N_pad - N), (0, 0))) if N_pad != N else x

    # --- VMEM limit derived from actual buffer sizes -------------------------
    io_bytes = 2 * (2 * TM * F * f32_b)          # x + out tiles, double-buffered
    vmem_limit = min(budget, int((resident + io_bytes) * 1.15) + (2 << 20))
    vmem_limit = max(vmem_limit, 4 << 20)

    def pinned(shape):
        idx = lambda i: (0,) * len(shape)
        if single_buffer_pinned:
            # Constant-index blocks never re-fetch: one buffer is enough.
            return pl.BlockSpec(shape, idx, pipeline_mode=pl.Buffered(1))
        return pl.BlockSpec(shape, idx)

    out = pl.pallas_call(
        _linear_block_kernel,
        out_shape=jax.ShapeDtypeStruct((N_pad, F), out_dtype),
        grid=(n_tiles,),
        in_specs=[
            # x tile, software-pipelined across the batch grid.
            # (Only deepen to pl.Buffered(3) if profiling shows exposed DMA.)
            pl.BlockSpec((TM, F), lambda i: (i, 0)),
            pinned((F, F)),                      # w1 (folded, bf16, resident)
            pinned((1, F)),                      # t1 shift (f32)
            pinned((F, F)),                      # w2 (folded, bf16, resident)
            pinned((1, F)),                      # t2 shift (f32)
        ],
        out_specs=pl.BlockSpec((TM, F), lambda i: (i, 0)),
        compiler_params=pltpu.CompilerParams(
            dimension_semantics=("parallel",),   # megacore-shard batch (v7x)
            vmem_limit_bytes=int(vmem_limit),
        ),
    )(x_p, folded["w1f"], folded["t1"], folded["w2f"], folded["t2"])

    return out[:N] if N_pad != N else out


def linear_block(x, folded, out_dtype=None):
    """x: (N, F) float32.  `folded`: output of prepare_params (BN/bias already
    folded into bf16 weights + f32 shifts).  Pass out_dtype=jnp.bfloat16 if the
    consumer accepts bf16 (cuts output HBM traffic in the mem-bound regime)."""
    out_dtype = x.dtype if out_dtype is None else out_dtype
    try:
        return _launch(x, folded, out_dtype, single_buffer_pinned=True)
    except AssertionError:
        raise
    except Exception:
        # Fallback if this jax/Mosaic version rejects pl.Buffered(1)
        # single-buffering on pinned operands.
        return _launch(x, folded, out_dtype, single_buffer_pinned=False)


# ---------------------------------------------------------------------------
# Parameter init (matches PyTorch defaults); weights stored pre-transposed
# as (in, out) so no transpose is ever materialized in the hot path.
# ---------------------------------------------------------------------------
def init_params(key, linear_size):
    F = linear_size
    k1, k2, k3, k4 = jax.random.split(key, 4)
    bound = 1.0 / jnp.sqrt(F)
    w1 = jax.random.uniform(k1, (F, F), jnp.float32, -bound, bound)  # (out, in)
    w2 = jax.random.uniform(k3, (F, F), jnp.float32, -bound, bound)
    return {
        "w1t": w1.T,  # stored as (in, out)
        "w2t": w2.T,
        "b1": jax.random.uniform(k2, (F,), jnp.float32, -bound, bound),
        "b2": jax.random.uniform(k4, (F,), jnp.float32, -bound, bound),
        # BatchNorm1d defaults: gamma=1, beta=0, running_mean=0, running_var=1
        "g1": jnp.ones((F,), jnp.float32), "beta1": jnp.zeros((F,), jnp.float32),
        "m1": jnp.zeros((F,), jnp.float32), "v1": jnp.ones((F,), jnp.float32),
        "g2": jnp.ones((F,), jnp.float32), "beta2": jnp.zeros((F,), jnp.float32),
        "m2": jnp.zeros((F,), jnp.float32), "v2": jnp.ones((F,), jnp.float32),
    }


def _reference(x, params, eps=1e-5):
    """Pure-JAX f32 reference of the PyTorch module in eval mode."""
    def bn(z, g, b, m, v):
        return (z - m) / jnp.sqrt(v + eps) * g + b
    y = x @ params["w1t"] + params["b1"]
    y = jnp.maximum(bn(y, params["g1"], params["beta1"], params["m1"], params["v1"]), 0.0)
    y = y @ params["w2t"] + params["b2"]
    y = jnp.maximum(bn(y, params["g2"], params["beta2"], params["m2"], params["v2"]), 0.0)
    return x + y


if __name__ == "__main__":
    linear_size = 256
    batch = 8

    key = jax.random.PRNGKey(0)
    kx, kp = jax.random.split(key)
    x = jax.random.normal(kx, (batch, linear_size), jnp.float32)
    params = init_params(kp, linear_size)

    folded = prepare_params(params)              # one-time fold, off hot path
    folded = jax.tree_util.tree_map(jax.block_until_ready, folded)

    out = linear_block(x, folded)
    out = jax.block_until_ready(out)

    ref = _reference(x, params)
    assert out.shape == (batch, linear_size)
    # Tolerance accounts for bf16 matmul inputs (f32 accumulation) vs f32 ref.
    assert jnp.allclose(out, ref, atol=5e-2, rtol=5e-2), "mismatch vs reference"

    print("KERNEL_OK")
</pallas_src>

<mosaic_0001>
module attributes {stable_mosaic.version = 11 : i64} {
  func.func @_linear_block_kernel(%arg0: i32, %arg1: memref<8x256xf32, #tpu.memory_space<vmem>>, %arg2: memref<256x256xbf16, #tpu.memory_space<vmem>>, %arg3: memref<1x256xf32, #tpu.memory_space<vmem>>, %arg4: memref<256x256xbf16, #tpu.memory_space<vmem>>, %arg5: memref<1x256xf32, #tpu.memory_space<vmem>>, %arg6: memref<8x256xf32, #tpu.memory_space<vmem>>) attributes {dimension_semantics = [#tpu.dimension_semantics<parallel>], iteration_bounds = array<i64: 1>, scalar_prefetch = 0 : i64, scratch_operands = 0 : i64, tpu.core_type = #tpu.core_type<tc>, window_params = [{transform_indices = @transform_0, window_bounds = array<i64: 8, 256>}, {pipeline_mode = #tpu.pipeline_mode<synchronous>, transform_indices = @transform_1, window_bounds = array<i64: 256, 256>}, {pipeline_mode = #tpu.pipeline_mode<synchronous>, transform_indices = @transform_2, window_bounds = array<i64: 1, 256>}, {pipeline_mode = #tpu.pipeline_mode<synchronous>, transform_indices = @transform_3, window_bounds = array<i64: 256, 256>}, {pipeline_mode = #tpu.pipeline_mode<synchronous>, transform_indices = @transform_4, window_bounds = array<i64: 1, 256>}, {transform_indices = @transform_5, window_bounds = array<i64: 8, 256>}]} {
    %c0 = arith.constant 0 : index
    %c0_0 = arith.constant 0 : index
    %0 = vector.load %arg1[%c0, %c0_0] : memref<8x256xf32, #tpu.memory_space<vmem>>, vector<8x256xf32>
    %1 = arith.truncf %0 : vector<8x256xf32> to vector<8x256xbf16>
    %c0_1 = arith.constant 0 : index
    %c0_2 = arith.constant 0 : index
    %2 = vector.load %arg2[%c0_1, %c0_2] : memref<256x256xbf16, #tpu.memory_space<vmem>>, vector<256x256xbf16>
    %cst = arith.constant dense<0.000000e+00> : vector<8x256xf32>
    %3 = tpu.matmul %1, %2, %cst {dimension_numbers = #tpu.dot_dimension_numbers<[1], [0], [0], [1], [0, 0, 1, 1], [], []>} : vector<8x256xbf16>, vector<256x256xbf16>, vector<8x256xf32> -> vector<8x256xf32>
    %c0_3 = arith.constant 0 : index
    %c0_4 = arith.constant 0 : index
    %4 = vector.load %arg3[%c0_3, %c0_4] : memref<1x256xf32, #tpu.memory_space<vmem>>, vector<1x256xf32>
    %5 = vector.broadcast %4 : vector<1x256xf32> to vector<8x256xf32>
    %6 = arith.addf %3, %5 : vector<8x256xf32>
    %cst_5 = arith.constant 0.000000e+00 : f32
    %7 = vector.broadcast %cst_5 : f32 to vector<8x256xf32>
    %8 = arith.maximumf %6, %7 : vector<8x256xf32>
    %9 = arith.truncf %8 : vector<8x256xf32> to vector<8x256xbf16>
    %c0_6 = arith.constant 0 : index
    %c0_7 = arith.constant 0 : index
    %10 = vector.load %arg4[%c0_6, %c0_7] : memref<256x256xbf16, #tpu.memory_space<vmem>>, vector<256x256xbf16>
    %cst_8 = arith.constant dense<0.000000e+00> : vector<8x256xf32>
    %11 = tpu.matmul %9, %10, %cst_8 {dimension_numbers = #tpu.dot_dimension_numbers<[1], [0], [0], [1], [0, 0, 1, 1], [], []>} : vector<8x256xbf16>, vector<256x256xbf16>, vector<8x256xf32> -> vector<8x256xf32>
    %c0_9 = arith.constant 0 : index
    %c0_10 = arith.constant 0 : index
    %12 = vector.load %arg5[%c0_9, %c0_10] : memref<1x256xf32, #tpu.memory_space<vmem>>, vector<1x256xf32>
    %13 = vector.broadcast %12 : vector<1x256xf32> to vector<8x256xf32>
    %14 = arith.addf %11, %13 : vector<8x256xf32>
    %cst_11 = arith.constant 0.000000e+00 : f32
    %15 = vector.broadcast %cst_11 : f32 to vector<8x256xf32>
    %16 = arith.maximumf %14, %15 : vector<8x256xf32>
    %17 = arith.addf %0, %16 : vector<8x256xf32>
    %c0_12 = arith.constant 0 : index
    %c0_13 = arith.constant 0 : index
    %18 = vector.load %arg6[%c0_12, %c0_13] : memref<8x256xf32, #tpu.memory_space<vmem>>, vector<8x256xf32>
    tpu.vector_store %arg6[%c0_12, %c0_13], %17 {strides = array<i32>} : memref<8x256xf32, #tpu.memory_space<vmem>>, vector<8x256xf32>,
    return
  }
  func.func @transform_0(%arg0: i32) -> (i32, i32) {
    %c0_i32 = arith.constant 0 : i32
    %c0_i32_0 = arith.constant 0 : i32
    return %arg0, %c0_i32 : i32, i32
  }
  func.func @transform_1(%arg0: i32) -> (i32, i32) {
    %c0_i32 = arith.constant 0 : i32
    %c0_i32_0 = arith.constant 0 : i32
    %c0_i32_1 = arith.constant 0 : i32
    return %c0_i32, %c0_i32_0 : i32, i32
  }
  func.func @transform_2(%arg0: i32) -> (i32, i32) {
    %c0_i32 = arith.constant 0 : i32
    %c0_i32_0 = arith.constant 0 : i32
    %c0_i32_1 = arith.constant 0 : i32
    return %c0_i32, %c0_i32_0 : i32, i32
  }
  func.func @transform_3(%arg0: i32) -> (i32, i32) {
    %c0_i32 = arith.constant 0 : i32
    %c0_i32_0 = arith.constant 0 : i32
    %c0_i32_1 = arith.constant 0 : i32
    return %c0_i32, %c0_i32_0 : i32, i32
  }
  func.func @transform_4(%arg0: i32) -> (i32, i32) {
    %c0_i32 = arith.constant 0 : i32
    %c0_i32_0 = arith.constant 0 : i32
    %c0_i32_1 = arith.constant 0 : i32
    return %c0_i32, %c0_i32_0 : i32, i32
  }
  func.func @transform_5(%arg0: i32) -> (i32, i32) {
    %c0_i32 = arith.constant 0 : i32
    %c0_i32_0 = arith.constant 0 : i32
    return %arg0, %c0_i32 : i32, i32
  }
}

module attributes {stable_mosaic.version = 11 : i64} {
  func.func @_linear_block_kernel(%arg0: i32, %arg1: memref<8x256xf32, #tpu.memory_space<vmem>>, %arg2: memref<256x256xbf16, #tpu.memory_space<vmem>>, %arg3: memref<1x256xf32, #tpu.memory_space<vmem>>, %arg4: memref<256x256xbf16, #tpu.memory_space<vmem>>, %arg5: memref<1x256xf32, #tpu.memory_space<vmem>>, %arg6: memref<8x256xf32, #tpu.memory_space<vmem>>) attributes {dimension_semantics = [#tpu.dimension_semantics<parallel>], iteration_bounds = array<i64: 1>, scalar_prefetch = 0 : i64, scratch_operands = 0 : i64, tpu.core_type = #tpu.core_type<tc>, window_params = [{transform_indices = @transform_0, window_bounds = array<i64: 8, 256>}, {pipeline_mode = #tpu.pipeline_mode<synchronous>, transform_indices = @transform_1, window_bounds = array<i64: 256, 256>}, {pipeline_mode = #tpu.pipeline_mode<synchronous>, transform_indices = @transform_2, window_bounds = array<i64: 1, 256>}, {pipeline_mode = #tpu.pipeline_mode<synchronous>, transform_indices = @transform_3, window_bounds = array<i64: 256, 256>}, {pipeline_mode = #tpu.pipeline_mode<synchronous>, transform_indices = @transform_4, window_bounds = array<i64: 1, 256>}, {transform_indices = @transform_5, window_bounds = array<i64: 8, 256>}]} {
    %c0 = arith.constant 0 : index
    %c0_0 = arith.constant 0 : index
    %0 = vector.load %arg1[%c0, %c0_0] : memref<8x256xf32, #tpu.memory_space<vmem>>, vector<8x256xf32>
    %1 = arith.truncf %0 : vector<8x256xf32> to vector<8x256xbf16>
    %c0_1 = arith.constant 0 : index
    %c0_2 = arith.constant 0 : index
    %2 = vector.load %arg2[%c0_1, %c0_2] : memref<256x256xbf16, #tpu.memory_space<vmem>>, vector<256x256xbf16>
    %cst = arith.constant dense<0.000000e+00> : vector<8x256xf32>
    %3 = tpu.matmul %1, %2, %cst {dimension_numbers = #tpu.dot_dimension_numbers<[1], [0], [0], [1], [0, 0, 1, 1], [], []>} : vector<8x256xbf16>, vector<256x256xbf16>, vector<8x256xf32> -> vector<8x256xf32>
    %c0_3 = arith.constant 0 : index
    %c0_4 = arith.constant 0 : index
    %4 = vector.load %arg3[%c0_3, %c0_4] : memref<1x256xf32, #tpu.memory_space<vmem>>, vector<1x256xf32>
    %5 = vector.broadcast %4 : vector<1x256xf32> to vector<8x256xf32>
    %6 = arith.addf %3, %5 : vector<8x256xf32>
    %cst_5 = arith.constant 0.000000e+00 : f32
    %7 = vector.broadcast %cst_5 : f32 to vector<8x256xf32>
    %8 = arith.maximumf %6, %7 : vector<8x256xf32>
    %9 = arith.truncf %8 : vector<8x256xf32> to vector<8x256xbf16>
    %c0_6 = arith.constant 0 : index
    %c0_7 = arith.constant 0 : index
    %10 = vector.load %arg4[%c0_6, %c0_7] : memref<256x256xbf16, #tpu.memory_space<vmem>>, vector<256x256xbf16>
    %cst_8 = arith.constant dense<0.000000e+00> : vector<8x256xf32>
    %11 = tpu.matmul %9, %10, %cst_8 {dimension_numbers = #tpu.dot_dimension_numbers<[1], [0], [0], [1], [0, 0, 1, 1], [], []>} : vector<8x256xbf16>, vector<256x256xbf16>, vector<8x256xf32> -> vector<8x256xf32>
    %c0_9 = arith.constant 0 : index
    %c0_10 = arith.constant 0 : index
    %12 = vector.load %arg5[%c0_9, %c0_10] : memref<1x256xf32, #tpu.memory_space<vmem>>, vector<1x256xf32>
    %13 = vector.broadcast %12 : vector<1x256xf32> to vector<8x256xf32>
    %14 = arith.addf %11, %13 : vector<8x256xf32>
    %cst_11 = arith.constant 0.000000e+00 : f32
    %15 = vector.broadcast %cst_11 : f32 to vector<8x256xf32>
    %16 = arith.maximumf %14, %15 : vector<8x256xf32>
    %17 = arith.addf %0, %16 : vector<8x256xf32>
    %c0_12 = arith.constant 0 : index
    %c0_13 = arith.constant 0 : index
    %18 = vector.load %arg6[%c0_12, %c0_13] : memref<8x256xf32, #tpu.memory_space<vmem>>, vector<8x256xf32>
    tpu.vector_store %arg6[%c0_12, %c0_13], %17 {strides = array<i32>} : memref<8x256xf32, #tpu.memory_space<vmem>>, vector<8x256xf32>,
    return
  }
  func.func @transform_0(%arg0: i32) -> (i32, i32) {
    %c0_i32 = arith.constant 0 : i32
    %c0_i32_0 = arith.constant 0 : i32
    return %arg0, %c0_i32 : i32, i32
  }
  func.func @transform_1(%arg0: i32) -> (i32, i32) {
    %c0_i32 = arith.constant 0 : i32
    %c0_i32_0 = arith.constant 0 : i32
    %c0_i32_1 = arith.constant 0 : i32
    return %c0_i32, %c0_i32_0 : i32, i32
  }
  func.func @transform_2(%arg0: i32) -> (i32, i32) {
    %c0_i32 = arith.constant 0 : i32
    %c0_i32_0 = arith.constant 0 : i32
    %c0_i32_1 = arith.constant 0 : i32
    return %c0_i32, %c0_i32_0 : i32, i32
  }
  func.func @transform_3(%arg0: i32) -> (i32, i32) {
    %c0_i32 = arith.constant 0 : i32
    %c0_i32_0 = arith.constant 0 : i32
    %c0_i32_1 = arith.constant 0 : i32
    return %c0_i32, %c0_i32_0 : i32, i32
  }
  func.func @transform_4(%arg0: i32) -> (i32, i32) {
    %c0_i32 = arith.constant 0 : i32
    %c0_i32_0 = arith.constant 0 : i32
    %c0_i32_1 = arith.constant 0 : i32
    return %c0_i32, %c0_i32_0 : i32, i32
  }
  func.func @transform_5(%arg0: i32) -> (i32, i32) {
    %c0_i32 = arith.constant 0 : i32
    %c0_i32_0 = arith.constant 0 : i32
    return %arg0, %c0_i32 : i32, i32
  }
}

</mosaic_0001>

<bundles_post_ra>
// kernel: tpu_custom_call.1
= control target key start
LH: loop header
LB: loop body
LE: loop exit
PB: predicated region body
PF: predicated region fallthrough
CT: control target
= control target key end

     0   :  { %10 = vsyncpa [#allocation3], 0  ;;  %s1133_s0 = inlined_call_operand.hbm [shape: f32[8,256], index: 0, kind: input, shape index: {}]   ;;  %s1134_s1 = inlined_call_operand.hbm [shape: bf16[256,256], index: 1, kind: input, shape index: {}]   ;;  %s1135_s2 = inlined_call_operand.hbm [shape: f32[1,256], index: 2, kind: input, shape index: {}]   ;;  %s1136_s3 = inlined_call_operand.hbm [shape: bf16[256,256], index: 3, kind: input, shape index: {}]   ;;  %s1137_s4 = inlined_call_operand.vmem [shape: f32[1,256], index: 4, kind: input, shape index: {}]   ;;  %s1138_s5 = inlined_call_operand.hbm [shape: f32[8,256], index: 5, kind: output, shape index: {}]  }
   0x1   :  { %11 = vsyncpa [#allocation6], 0 }
   0x2   :  { %12 = vsyncpa [#allocation9], 0  ;;  %s29_s20 = sshll.u32 %s1134_s1, 4  ;;  %s30_s20 = int_to_ptr.hbm [resolvable:$true] %s29_s20 }
   0x3   :  { %13 = vsyncpa [#allocation4], 0  ;;  %s1068_s21 = smov [#allocation5]   ;;  %s19_s25 = sshll.u32 %s1133_s0, 4  ;;  %s20_s25 = int_to_ptr.hbm [resolvable:$true] %s19_s25 }
   0x4   :  { %s31_s22 = sshll.u32 %s1068_s21, 4  ;;  %s1069_s26 = smov 128   ;;  %s32_s22 = int_to_ptr.vmem [resolvable:$true] %s31_s22 }
   0x5   :  { %s1070_s27 = smov 8   ;;  %s1071_s28 = smov [#allocation2]  }
   0x6   :  { %37 = dma.hbm_to_vmem [thread:$0]  %s30_s20, 4096, %s32_s22, [#allocation6], %s1069_s26, %s1069_s26, %s1070_s27  }
   0x7   :  { %s21_s29 = sshll.u32 %s1071_s28, 4  ;;  %s43_s7 = sshll.u32 %s1135_s2, 4  ;;  %s22_s29 = int_to_ptr.vmem [resolvable:$true] %s21_s29  ;;  %s44_s7 = int_to_ptr.hbm [resolvable:$true] %s43_s7 }
   0x8   :  { %24 = dma.hbm_to_vmem [thread:$0]  %s20_s25, 256, %s22_s29, [#allocation3]  }
   0x9   :  { %s53_s9 = sshll.u32 %s1136_s3, 4  ;;  %s1072_s10 = smov [#allocation7]   ;;  %s54_s9 = int_to_ptr.hbm [resolvable:$true] %s53_s9 }
   0xa   :  { %s45_s11 = sshll.u32 %s1072_s10, 4  ;;  %s1073_s0 = smov [#allocation8]   ;;  %s46_s11 = int_to_ptr.vmem [resolvable:$true] %s45_s11 }
   0xb   :  { %48 = dma.hbm_to_vmem [thread:$0]  %s44_s7, 32, %s46_s11, [#allocation6]  }
   0xc   :  { %s55_s12 = sshll.u32 %s1073_s0, 4  ;;  %s56_s12 = int_to_ptr.vmem [resolvable:$true] %s55_s12 }
   0xd   :  { %61 = dma.hbm_to_vmem [thread:$0]  %s54_s9, 4096, %s56_s12, [#allocation9], %s1069_s26, %s1069_s26, %s1070_s27  }
   0xe   :  { %1060 = dma.done.wait [#allocation3], 256  }
   0xf   :  { %1061 = vsyncadd [#allocation3], 4294967040 }
  0x10   :  { %1062 = dma.done.wait [#allocation6], 4128  }
  0x11   :  { %1063 = vsyncadd [#allocation6], 4294963168 }
  0x12   :  { %1064 = dma.done.wait [#allocation9], 4096  }
  0x13   :  { %1065 = vsyncadd [#allocation9], 4294963200  ;;  %v671_v0 = vld [vmem:[#allocation5 + $0x70] sm:$0xf]  ;;  %v884_v1 = vld [vmem:[#allocation5 + $0x74] sm:$0xf0] }
  0x14   :  { %v735_v2 = vld [vmem:[#allocation5 + $0xf0] sm:$0xf]  ;;  %v672_v3 = vor.u32 %v884_v1, %v671_v0  ;;  %v900_v4 = vld [vmem:[#allocation5 + $0xf4] sm:$0xf0]  ;;  %v883_v5 = vld [vmem:[#allocation5 + $0x74] sm:$0xf] }
  0x15   :  { %v673_v6 = vld [vmem:[#allocation5 + $0x78] sm:$0xf0]  ;;  %v736_v7 = vor.u32 %v900_v4, %v735_v2  ;;  %v899_v9 = vld [vmem:[#allocation5 + $0xf4] sm:$0xf]  ;;  %v663_v11 = vld [vmem:[#allocation5 + $0x60] sm:$0xf] }
  0x16   :  { %v676_v8 = vor.u32 %v883_v5, %v673_v6  ;;  %v737_v10 = vld [vmem:[#allocation5 + $0xf8] sm:$0xf0]  ;;  %282 = vmatpush.bf16.msra.mxu0 %v672_v3  ;;  %v882_v13 = vld [vmem:[#allocation5 + $0x64] sm:$0xf0]  ;;  %v727_v14 = vld [vmem:[#allocation5 + $0xe0] sm:$0xf] }
  0x17   :  { %v740_v12 = vor.u32 %v899_v9, %v737_v10  ;;  %v898_v15 = vld [vmem:[#allocation5 + $0xe4] sm:$0xf0]  ;;  %295 = vmatpush.bf16.msra.mxu1 %v736_v7  ;;  %v664_v16 = vor.u32 %v882_v13, %v663_v11  ;;  %v881_v18 = vld [vmem:[#allocation5 + $0x64] sm:$0xf]  ;;  %v665_v19 = vld [vmem:[#allocation5 + $0x68] sm:$0xf0] }
  0x18   :  { %308 = vmatpush.bf16.msra.mxu2 %v676_v8  ;;  %v728_v17 = vor.u32 %v898_v15, %v727_v14  ;;  %v897_v20 = vld [vmem:[#allocation5 + $0xe4] sm:$0xf]  ;;  %v668_v21 = vor.u32 %v881_v18, %v665_v19  ;;  %v729_v22 = vld [vmem:[#allocation5 + $0xe8] sm:$0xf0]  ;;  %v655_v23 = vld [vmem:[#allocation5 + $0x50] sm:$0xf] }
  0x19   :  { %321 = vmatpush.bf16.msra.mxu3 %v740_v12  ;;  %v880_v24 = vld [vmem:[#allocation5 + $0x54] sm:$0xf0]  ;;  %v732_v25 = vor.u32 %v897_v20, %v729_v22  ;;  %v719_v26 = vld [vmem:[#allocation5 + $0xd0] sm:$0xf]  ;;  %v879_v28 = vld [vmem:[#allocation5 + $0x54] sm:$0xf] }
  0x1a   :  { %v896_v27 = vld [vmem:[#allocation5 + $0xd4] sm:$0xf0]  ;;  %283 = vmatpush.bf16.msra.mxu0 %v664_v16  ;;  %v656_v29 = vor.u32 %v880_v24, %v655_v23  ;;  %v657_v30 = vld [vmem:[#allocation5 + $0x58] sm:$0xf0]  ;;  %v895_v31 = vld [vmem:[#allocation5 + $0xd4] sm:$0xf] }
  0x1b   :  { %v721_v32 = vld [vmem:[#allocation5 + $0xd8] sm:$0xf0]  ;;  %296 = vmatpush.bf16.msra.mxu1 %v728_v17  ;;  %v720_v33 = vor.u32 %v896_v27, %v719_v26  ;;  %v660_v34 = vor.u32 %v879_v28, %v657_v30  ;;  %v647_v35 = vld [vmem:[#allocation5 + $0x40] sm:$0xf]  ;;  %v878_v36 = vld [vmem:[#allocation5 + $0x44] sm:$0xf0] }
  0x1c   :  { %309 = vmatpush.bf16.msra.mxu2 %v668_v21  ;;  %v711_v37 = vld [vmem:[#allocation5 + $0xc0] sm:$0xf]  ;;  %v724_v38 = vor.u32 %v895_v31, %v721_v32  ;;  %v894_v39 = vld [vmem:[#allocation5 + $0xc4] sm:$0xf0]  ;;  %v877_v40 = vld [vmem:[#allocation5 + $0x44] sm:$0xf]  ;;  %v648_v44 = vor.u32 %v878_v36, %v647_v35 }
  0x1d   :  { %322 = vmatpush.bf16.msra.mxu3 %v732_v25  ;;  %v649_v41 = vld [vmem:[#allocation5 + $0x48] sm:$0xf0]  ;;  %v893_v42 = vld [vmem:[#allocation5 + $0xc4] sm:$0xf]  ;;  %v712_v45 = vor.u32 %v894_v39, %v711_v37  ;;  %v639_v47 = vld [vmem:[#allocation5 + $0x30] sm:$0xf] }
  0x1e   :  { %v713_v43 = vld [vmem:[#allocation5 + $0xc8] sm:$0xf0]  ;;  %284 = vmatpush.bf16.msra.mxu0 %v656_v29  ;;  %v652_v46 = vor.u32 %v877_v40, %v649_v41  ;;  %v876_v48 = vld [vmem:[#allocation5 + $0x34] sm:$0xf0]  ;;  %v703_v49 = vld [vmem:[#allocation5 + $0xb0] sm:$0xf] }
  0x1f   :  { %297 = vmatpush.bf16.msra.mxu1 %v720_v33  ;;  %v716_v50 = vor.u32 %v893_v42, %v713_v43  ;;  %v892_v51 = vld [vmem:[#allocation5 + $0xb4] sm:$0xf0]  ;;  %v875_v52 = vld [vmem:[#allocation5 + $0x34] sm:$0xf]  ;;  %v641_v53 = vld [vmem:[#allocation5 + $0x38] sm:$0xf0]  ;;  %v640_v56 = vor.u32 %v876_v48, %v639_v47 }
  0x20   :  { %310 = vmatpush.bf16.msra.mxu2 %v660_v34  ;;  %v891_v54 = vld [vmem:[#allocation5 + $0xb4] sm:$0xf]  ;;  %v705_v55 = vld [vmem:[#allocation5 + $0xb8] sm:$0xf0]  ;;  %v704_v57 = vor.u32 %v892_v51, %v703_v49  ;;  %v644_v58 = vor.u32 %v875_v52, %v641_v53  ;;  %v631_v59 = vld [vmem:[#allocation5 + $0x20] sm:$0xf] }
  0x21   :  { %323 = vmatpush.bf16.msra.mxu3 %v724_v38  ;;  %v874_v60 = vld [vmem:[#allocation5 + $0x24] sm:$0xf0]  ;;  %v695_v61 = vld [vmem:[#allocation5 + $0xa0] sm:$0xf]  ;;  %v708_v62 = vor.u32 %v891_v54, %v705_v55  ;;  %v873_v0 = vld [vmem:[#allocation5 + $0x24] sm:$0xf] }
  0x22   :  { %285 = vmatpush.bf16.msra.mxu0 %v648_v44  ;;  %v890_v63 = vld [vmem:[#allocation5 + $0xa4] sm:$0xf0]  ;;  %v633_v1 = vld [vmem:[#allocation5 + $0x28] sm:$0xf0]  ;;  %v889_v2 = vld [vmem:[#allocation5 + $0xa4] sm:$0xf]  ;;  %v632_v4 = vor.u32 %v874_v60, %v631_v59 }
  0x23   :  { %298 = vmatpush.bf16.msra.mxu1 %v712_v45  ;;  %v697_v3 = vld [vmem:[#allocation5 + $0xa8] sm:$0xf0]  ;;  %v696_v5 = vor.u32 %v890_v63, %v695_v61  ;;  %v636_v6 = vor.u32 %v873_v0, %v633_v1  ;;  %v623_v7 = vld [vmem:[#allocation5 + $0x10] sm:$0xf]  ;;  %v872_v8 = vld [vmem:[#allocation5 + $0x14] sm:$0xf0] }
  0x24   :  { %311 = vmatpush.bf16.msra.mxu2 %v652_v46  ;;  %v687_v9 = vld [vmem:[#allocation5 + $0x90] sm:$0xf]  ;;  %v700_v10 = vor.u32 %v889_v2, %v697_v3  ;;  %v888_v11 = vld [vmem:[#allocation5 + $0x94] sm:$0xf0]  ;;  %v871_v12 = vld [vmem:[#allocation5 + $0x14] sm:$0xf]  ;;  %v624_v16 = vor.u32 %v872_v8, %v623_v7 }
  0x25   :  { %324 = vmatpush.bf16.msra.mxu3 %v716_v50  ;;  %v625_v13 = vld [vmem:[#allocation5 + $0x18] sm:$0xf0]  ;;  %v887_v14 = vld [vmem:[#allocation5 + $0x94] sm:$0xf]  ;;  %v615_v17 = vld [vmem:[#allocation5] sm:$0xf]  ;;  %v688_v18 = vor.u32 %v888_v11, %v687_v9 }
  0x26   :  { %286 = vmatpush.bf16.msra.mxu0 %v640_v56  ;;  %v689_v15 = vld [vmem:[#allocation5 + $0x98] sm:$0xf0]  ;;  %v628_v19 = vor.u32 %v871_v12, %v625_v13  ;;  %v870_v20 = vld [vmem:[#allocation5 + $0x4] sm:$0xf0]  ;;  %v679_v21 = vld [vmem:[#allocation5 + $0x80] sm:$0xf] }
  0x27   :  { %299 = vmatpush.bf16.msra.mxu1 %v704_v57  ;;  %v886_v22 = vld [vmem:[#allocation5 + $0x84] sm:$0xf0]  ;;  %v692_v23 = vor.u32 %v887_v14, %v689_v15  ;;  %v869_v24 = vld [vmem:[#allocation5 + $0x4] sm:$0xf]  ;;  %v617_v25 = vld [vmem:[#allocation5 + $0x8] sm:$0xf0]  ;;  %v616_v30 = vor.u32 %v870_v20, %v615_v17 }
  0x28   :  { %312 = vmatpush.bf16.msra.mxu2 %v644_v58  ;;  %v885_v26 = vld [vmem:[#allocation5 + $0x84] sm:$0xf]  ;;  %v681_v27 = vld [vmem:[#allocation5 + $0x88] sm:$0xf0]  ;;  %v799_v28 = vld [vmem:[#allocation8 + $0x70] sm:$0xf]  ;;  %v680_v34 = vor.u32 %v886_v22, %v679_v21  ;;  %v620_v35 = vor.u32 %v869_v24, %v617_v25 }
  0x29   :  { %325 = vmatpush.bf16.msra.mxu3 %v708_v62  ;;  %v916_v29 = vld [vmem:[#allocation8 + $0x74] sm:$0xf0]  ;;  %v1117_v31 = vld [vmem:[#allocation2] sm:$0xff]  ;;  %v801_v33 = vld [vmem:[#allocation8 + $0x78] sm:$0xf0]  ;;  %v684_v37 = vor.u32 %v885_v26, %v681_v27  ;;  %s1074_s13 = smov [#allocation10]  }
  0x2a   :  { %287 = vmatpush.bf16.msra.mxu0 %v632_v4  ;;  %v915_v32 = vld [vmem:[#allocation8 + $0x74] sm:$0xf]  ;;  %v800_v38 = vor.u32 %v916_v29, %v799_v28  ;;  %v791_v39 = vld [vmem:[#allocation8 + $0x60] sm:$0xf]  ;;  %v863_v40 = vld [vmem:[#allocation8 + $0xf0] sm:$0xf]  ;;  %v82_v42 = vpack.c.bf16 %v1117_v31, %v1117_v31 }
  0x2b   :  { %300 = vmatpush.bf16.msra.mxu1 %v696_v5  ;;  %v1119_v36 = vld [vmem:[#allocation2 + $0x8] sm:$0xff]  ;;  %v804_v43 = vor.u32 %v915_v32, %v801_v33  ;;  %v914_v44 = vld [vmem:[#allocation8 + $0x64] sm:$0xf0]  ;;  %v913_v48 = vld [vmem:[#allocation8 + $0x64] sm:$0xf]  ;;  %s599_s14 = sshll.u32 %s1074_s13, 4  ;;  %s600_s14 = int_to_ptr.vmem [resolvable:$true] %s599_s14 }
  0x2c   :  { %313 = vmatpush.bf16.msra.mxu2 %v636_v6  ;;  %v932_v41 = vld [vmem:[#allocation8 + $0xf4] sm:$0xf0]  ;;  %v931_v45 = vld [vmem:[#allocation8 + $0xf4] sm:$0xf]  ;;  %v865_v46 = vld [vmem:[#allocation8 + $0xf8] sm:$0xf0]  ;;  %v83_v47 = vpack.c.bf16 %v1119_v36, %v1119_v36  ;;  %v792_v51 = vor.u32 %v914_v44, %v791_v39 }
  0x2d   :  { %326 = vmatpush.bf16.msra.mxu3 %v700_v10  ;;  %v793_v49 = vld [vmem:[#allocation8 + $0x68] sm:$0xf0]  ;;  %v864_v50 = vor.u32 %v932_v41, %v863_v40  ;;  %v868_v52 = vor.u32 %v931_v45, %v865_v46  ;;  %v783_v53 = vld [vmem:[#allocation8 + $0x50] sm:$0xf]  ;;  %v855_v54 = vld [vmem:[#allocation8 + $0xe0] sm:$0xf] }
  0x2e   :  { %288 = vmatpush.bf16.msra.mxu0 %v624_v16  ;;  %v930_v55 = vld [vmem:[#allocation8 + $0xe4] sm:$0xf0]  ;;  %v796_v56 = vor.u32 %v913_v48, %v793_v49  ;;  %v912_v57 = vld [vmem:[#allocation8 + $0x54] sm:$0xf0]  ;;  %v929_v58 = vld [vmem:[#allocation8 + $0xe4] sm:$0xf] }
  0x2f   :  { %301 = vmatpush.bf16.msra.mxu1 %v688_v18  ;;  %v857_v59 = vld [vmem:[#allocation8 + $0xe8] sm:$0xf0]  ;;  %v911_v60 = vld [vmem:[#allocation8 + $0x54] sm:$0xf]  ;;  %v785_v61 = vld [vmem:[#allocation8 + $0x58] sm:$0xf0]  ;;  %v856_v62 = vor.u32 %v930_v55, %v855_v54  ;;  %v784_v63 = vor.u32 %v912_v57, %v783_v53 }
  0x30   :  { %314 = vmatpush.bf16.msra.mxu2 %v628_v19  ;;  %v860_v0 = vor.u32 %v929_v58, %v857_v59  ;;  %v775_v1 = vld [vmem:[#allocation8 + $0x40] sm:$0xf]  ;;  %v847_v2 = vld [vmem:[#allocation8 + $0xd0] sm:$0xf]  ;;  %v928_v3 = vld [vmem:[#allocation8 + $0xd4] sm:$0xf0]  ;;  %v788_v4 = vor.u32 %v911_v60, %v785_v61 }
  0x31   :  { %327 = vmatpush.bf16.msra.mxu3 %v692_v23  ;;  %v910_v5 = vld [vmem:[#allocation8 + $0x44] sm:$0xf0]  ;;  %v927_v6 = vld [vmem:[#allocation8 + $0xd4] sm:$0xf]  ;;  %v849_v7 = vld [vmem:[#allocation8 + $0xd8] sm:$0xf0]  ;;  %v848_v10 = vor.u32 %v928_v3, %v847_v2 }
  0x32   :  { %289 = vmatpush.bf16.msra.mxu0 %v616_v30  ;;  %v909_v8 = vld [vmem:[#allocation8 + $0x44] sm:$0xf]  ;;  %v777_v9 = vld [vmem:[#allocation8 + $0x48] sm:$0xf0]  ;;  %v776_v11 = vor.u32 %v910_v5, %v775_v1  ;;  %v852_v12 = vor.u32 %v927_v6, %v849_v7  ;;  %v767_v13 = vld [vmem:[#allocation8 + $0x30] sm:$0xf] }
  0x33   :  { %302 = vmatpush.bf16.msra.mxu1 %v680_v34  ;;  %v839_v14 = vld [vmem:[#allocation8 + $0xc0] sm:$0xf]  ;;  %v926_v15 = vld [vmem:[#allocation8 + $0xc4] sm:$0xf0]  ;;  %v780_v16 = vor.u32 %v909_v8, %v777_v9  ;;  %v908_v17 = vld [vmem:[#allocation8 + $0x34] sm:$0xf0] }
  0x34   :  { %315 = vmatpush.bf16.msra.mxu2 %v620_v35  ;;  %v925_v18 = vld [vmem:[#allocation8 + $0xc4] sm:$0xf]  ;;  %v841_v19 = vld [vmem:[#allocation8 + $0xc8] sm:$0xf0]  ;;  %v907_v20 = vld [vmem:[#allocation8 + $0x34] sm:$0xf]  ;;  %v840_v22 = vor.u32 %v926_v15, %v839_v14  ;;  %v768_v23 = vor.u32 %v908_v17, %v767_v13 }
  0x35   :  { %328 = vmatpush.bf16.msra.mxu3 %v684_v37  ;;  %290 = vmatmul.bf16.vlgmr.msra.gmra.mxu0 %v82_v42  ;;  %v769_v21 = vld [vmem:[#allocation8 + $0x38] sm:$0xf0]  ;;  %v844_v24 = vor.u32 %v925_v18, %v841_v19  ;;  %v759_v26 = vld [vmem:[#allocation8 + $0x20] sm:$0xf]  ;;  %v906_v27 = vld [vmem:[#allocation8 + $0x24] sm:$0xf0] }
  0x36   :  { %536 = vmatpush.bf16.msrb.mxu0 %v800_v38  ;;  %303 = vmatmul.bf16.vlgmr.msra.gmra.mxu1 %v83_v47  ;;  %v772_v25 = vor.u32 %v907_v20, %v769_v21  ;;  %v905_v28 = vld [vmem:[#allocation8 + $0x24] sm:$0xf]  ;;  %v761_v29 = vld [vmem:[#allocation8 + $0x28] sm:$0xf0]  ;;  %v760_v30 = vor.u32 %v906_v27, %v759_v26  ;;  %v831_v33 = vld [vmem:[#allocation8 + $0xb0] sm:$0xf] }
  0x37   :  { %316 = vmatmul.bf16.vlgmr.msra.gmra.mxu2 %v82_v42  ;;  %549 = vmatpush.bf16.msrb.mxu1 %v864_v50  ;;  %v764_v32 = vor.u32 %v905_v28, %v761_v29  ;;  %v924_v34 = vld [vmem:[#allocation8 + $0xb4] sm:$0xf0]  ;;  %v923_v35 = vld [vmem:[#allocation8 + $0xb4] sm:$0xf]  ;;  %v833_v38 = vld [vmem:[#allocation8 + $0xb8] sm:$0xf0] }
  0x38   :  { %562 = vmatpush.bf16.msrb.mxu2 %v804_v43  ;;  %329 = vmatmul.bf16.vlgmr.msra.gmra.mxu3 %v83_v47  ;;  %v832_v37 = vor.u32 %v924_v34, %v831_v33  ;;  %v836_v39 = vor.u32 %v923_v35, %v833_v38  ;;  %v751_v40 = vld [vmem:[#allocation8 + $0x10] sm:$0xf]  ;;  %v904_v41 = vld [vmem:[#allocation8 + $0x14] sm:$0xf0]  ;;  %v903_v42 = vld [vmem:[#allocation8 + $0x14] sm:$0xf] }
  0x39   :  { %575 = vmatpush.bf16.msrb.mxu3 %v868_v52  ;;  %v752_v43 = vor.u32 %v904_v41, %v751_v40  ;;  %v753_v44 = vld [vmem:[#allocation8 + $0x18] sm:$0xf0]  ;;  %v823_v46 = vld [vmem:[#allocation8 + $0xa0] sm:$0xf]  ;;  %v922_v47 = vld [vmem:[#allocation8 + $0xa4] sm:$0xf0] }
  0x3a   :  { %537 = vmatpush.bf16.msrb.mxu0 %v792_v51  ;;  %v756_v45 = vor.u32 %v903_v42, %v753_v44  ;;  %v921_v48 = vld [vmem:[#allocation8 + $0xa4] sm:$0xf]  ;;  %v824_v49 = vor.u32 %v922_v47, %v823_v46  ;;  %v825_v50 = vld [vmem:[#allocation8 + $0xa8] sm:$0xf0]  ;;  %v743_v52 = vld [vmem:[#allocation8] sm:$0xf] }
  0x3b   :  { %550 = vmatpush.bf16.msrb.mxu1 %v856_v62  ;;  %v828_v51 = vor.u32 %v921_v48, %v825_v50  ;;  %v902_v53 = vld [vmem:[#allocation8 + $0x4] sm:$0xf0]  ;;  %v901_v54 = vld [vmem:[#allocation8 + $0x4] sm:$0xf]  ;;  %v815_v58 = vld [vmem:[#allocation8 + $0x90] sm:$0xf] }
  0x3c   :  { %563 = vmatpush.bf16.msrb.mxu2 %v796_v56  ;;  %v744_v55 = vor.u32 %v902_v53, %v743_v52  ;;  %v745_v56 = vld [vmem:[#allocation8 + $0x8] sm:$0xf0]  ;;  %v920_v59 = vld [vmem:[#allocation8 + $0x94] sm:$0xf0]  ;;  %v919_v61 = vld [vmem:[#allocation8 + $0x94] sm:$0xf] }
  0x3d   :  { %576 = vmatpush.bf16.msrb.mxu3 %v860_v0  ;;  %v748_v57 = vor.u32 %v901_v54, %v745_v56  ;;  %v816_v60 = vor.u32 %v920_v59, %v815_v58  ;;  %v817_v62 = vld [vmem:[#allocation8 + $0x98] sm:$0xf0]  ;;  %v807_v0 = vld [vmem:[#allocation8 + $0x80] sm:$0xf]  ;;  %v918_v1 = vld [vmem:[#allocation8 + $0x84] sm:$0xf0] }
  0x3e   :  { %538 = vmatpush.bf16.msrb.mxu0 %v784_v63  ;;  %v820_v63 = vor.u32 %v919_v61, %v817_v62  ;;  %v917_v2 = vld [vmem:[#allocation8 + $0x84] sm:$0xf]  ;;  %v808_v3 = vor.u32 %v918_v1, %v807_v0  ;;  %v116_v6 = vld [vmem:[#allocation7] sm:$0x3]  ;;  %s601_s16 = sshll.u32 %s1138_s5, 4  ;;  %s602_s16 = int_to_ptr.hbm [resolvable:$true] %s601_s16 }
  0x3f   :  { %551 = vmatpush.bf16.msrb.mxu1 %v848_v10  ;;  %v118_v7 = vperm.slane %v116_v6, 0 }
  0x40   :  { %564 = vmatpush.bf16.msrb.mxu2 %v788_v4  ;;  %v809_v4 = vld [vmem:[#allocation8 + $0x88] sm:$0xf0] }
  0x41   :  { %577 = vmatpush.bf16.msrb.mxu3 %v852_v12  ;;  %v812_v5 = vor.u32 %v917_v2, %v809_v4  ;;  %v119_v12 = vperm.slane %v116_v6, 1 }
  0x42   :  { %539 = vmatpush.bf16.msrb.mxu0 %v776_v11 }
  0x43   :  { %552 = vmatpush.bf16.msrb.mxu1 %v840_v22 }
  0x44   :  { %565 = vmatpush.bf16.msrb.mxu2 %v780_v16 }
  0x45   :  { %578 = vmatpush.bf16.msrb.mxu3 %v844_v24 }
  0x46   :  { %540 = vmatpush.bf16.msrb.mxu0 %v768_v23 }
  0x47   :  { %553 = vmatpush.bf16.msrb.mxu1 %v832_v37 }
  0x48   :  { %566 = vmatpush.bf16.msrb.mxu2 %v772_v25  ;;  %v370_v25 = vld [vmem:[%s1137_s4] sm:$0x3] }
  0x49   :  { %579 = vmatpush.bf16.msrb.mxu3 %v836_v39  ;;  %v372_v26 = vperm.slane %v370_v25, 0  ;;  %v373_v29 = vperm.slane %v370_v25, 1 }
  0x4a   :  { %541 = vmatpush.bf16.msrb.mxu0 %v760_v30 }
  0x4b   :  { %554 = vmatpush.bf16.msrb.mxu1 %v824_v49 }
  0x4c   :  { %567 = vmatpush.bf16.msrb.mxu2 %v764_v32 }
  0x4d   :  { %580 = vmatpush.bf16.msrb.mxu3 %v828_v51 }
  0x4e   :  { %542 = vmatpush.bf16.msrb.mxu0 %v752_v43 }
  0x4f   :  { %555 = vmatpush.bf16.msrb.mxu1 %v816_v60 }
  0x50   :  { %568 = vmatpush.bf16.msrb.mxu2 %v756_v45 }
  0x51   :  { %581 = vmatpush.bf16.msrb.mxu3 %v820_v63 }
  0x52   :  { %543 = vmatpush.bf16.msrb.mxu0 %v744_v55 }
  0x53   :  { %556 = vmatpush.bf16.msrb.mxu1 %v808_v3 }
  0x54   :  { %569 = vmatpush.bf16.msrb.mxu2 %v748_v57 }
  0x55   :  { %582 = vmatpush.bf16.msrb.mxu3 %v812_v5 }
  0xb2   :  { %v291_v8 = vpop.f32.mrf.mxu0 }
  0xb3   :  { %v292_v9 = vadd.f32 %v291_v8, %v118_v7  ;;  %v304_v10 = vpop.f32.mrf.mxu1 }
  0xb5   :  { %v305_v11 = vadd.f32 %v304_v10, %v292_v9 }
  0xb7   :  { %v334_v13 = vmax.f32 %v305_v11, 0.0 }
  0xb9   :  { %v336_v14 = vpack.c.bf16 %v334_v13, %v334_v13 }
  0xba   :  { %v317_v15 = vpop.f32.mrf.mxu2  ;;  %v293_v18 = vpop.f32.mrf.mxu0 }
  0xbb   :  { %v318_v16 = vadd.f32 %v317_v15, %v119_v12  ;;  %v330_v17 = vpop.f32.mrf.mxu3  ;;  %v306_v19 = vpop.f32.mrf.mxu1  ;;  %544 = vmatmul.bf16.vlgmr.msrb.gmra.mxu0 %v336_v14  ;;  %570 = vmatmul.bf16.vlgmr.msrb.gmra.mxu2 %v336_v14 }
  0xbd   :  { %v331_v20 = vadd.f32 %v330_v17, %v318_v16 }
  0xbf   :  { %v335_v21 = vmax.f32 %v331_v20, 0.0 }
  0xc1   :  { %v337_v22 = vpack.c.bf16 %v335_v21, %v335_v21 }
  0xc2   :  { %v319_v23 = vpop.f32.mrf.mxu2 }
  0xc3   :  { %v332_v24 = vpop.f32.mrf.mxu3  ;;  %557 = vmatmul.bf16.vlgmr.msrb.gmra.mxu1 %v337_v22  ;;  %583 = vmatmul.bf16.vlgmr.msrb.gmra.mxu3 %v337_v22 }
 0x138   :  { %v545_v27 = vpop.f32.mrf.mxu0 }
 0x139   :  { %v546_v28 = vadd.f32 %v545_v27, %v372_v26 }
 0x13e   :  { %v571_v30 = vpop.f32.mrf.mxu2 }
 0x13f   :  { %v572_v37 = vadd.f32 %v571_v30, %v373_v29 }
 0x140   :  { %v558_v32 = vpop.f32.mrf.mxu1  ;;  %v547_v34 = vpop.f32.mrf.mxu0 }
 0x141   :  { %v559_v33 = vadd.f32 %v558_v32, %v546_v28 }
 0x143   :  { %v588_v35 = vmax.f32 %v559_v33, 0.0 }
 0x145   :  { %v590_v38 = vadd.f32 %v588_v35, %v1117_v31 }
 0x146   :  { %v584_v39 = vpop.f32.mrf.mxu3  ;;  %v573_v41 = vpop.f32.mrf.mxu2 }
 0x147   :  { %592 = vst [vmem:[#allocation10] sm:$0xff] %v590_v38  ;;  %v585_v40 = vadd.f32 %v584_v39, %v572_v37 }
 0x148   :  { %v560_v42 = vpop.f32.mrf.mxu1 }
 0x149   :  { %v589_v43 = vmax.f32 %v585_v40, 0.0 }
 0x14b   :  { %v591_v44 = vadd.f32 %v589_v43, %v1119_v36 }
 0x14d   :  { %593 = vst [vmem:[#allocation10 + $0x8] sm:$0xff] %v591_v44 }
 0x14e   :  { %v586_v45 = vpop.f32.mrf.mxu3  ;;  %604 = dma.vmem_to_hbm [thread:$0]  %s600_s14, 256, %s602_s16, [#allocation4]  }
 0x14f   :  { %1066 = dma.done.wait [#allocation4], 256  }
 0x150   :  { %1067 = vsyncadd [#allocation4], 4294967040 }
 0x151   :  { %609 = vsyncpa [#allocation3], 1 }
 0x152   :  { %610 = vsyncpa [#allocation6], 1 }
 0x153   :  { %611 = vsyncpa [#allocation9], 1 }
 0x154   :  { %612 = vsyncpa [#allocation4], 1 }

// kernel: tpu_custom_call.1
= control target key start
LH: loop header
LB: loop body
LE: loop exit
PB: predicated region body
PF: predicated region fallthrough
CT: control target
= control target key end

     0   :  { %10 = vsyncpa [#allocation3], 0  ;;  %s1133_s0 = inlined_call_operand.hbm [shape: f32[8,256], index: 0, kind: input, shape index: {}]   ;;  %s1134_s1 = inlined_call_operand.hbm [shape: bf16[256,256], index: 1, kind: input, shape index: {}]   ;;  %s1135_s2 = inlined_call_operand.hbm [shape: f32[1,256], index: 2, kind: input, shape index: {}]   ;;  %s1136_s3 = inlined_call_operand.hbm [shape: bf16[256,256], index: 3, kind: input, shape index: {}]   ;;  %s1137_s4 = inlined_call_operand.vmem [shape: f32[1,256], index: 4, kind: input, shape index: {}]   ;;  %s1138_s5 = inlined_call_operand.hbm [shape: f32[8,256], index: 5, kind: output, shape index: {}]  }
   0x1   :  { %11 = vsyncpa [#allocation6], 0 }
   0x2   :  { %12 = vsyncpa [#allocation9], 0  ;;  %s29_s20 = sshll.u32 %s1134_s1, 4  ;;  %s30_s20 = int_to_ptr.hbm [resolvable:$true] %s29_s20 }
   0x3   :  { %13 = vsyncpa [#allocation4], 0  ;;  %s1068_s21 = smov [#allocation5]   ;;  %s19_s25 = sshll.u32 %s1133_s0, 4  ;;  %s20_s25 = int_to_ptr.hbm [resolvable:$true] %s19_s25 }
   0x4   :  { %s31_s22 = sshll.u32 %s1068_s21, 4  ;;  %s1069_s26 = smov 128   ;;  %s32_s22 = int_to_ptr.vmem [resolvable:$true] %s31_s22 }
   0x5   :  { %s1070_s27 = smov 8   ;;  %s1071_s28 = smov [#allocation2]  }
   0x6   :  { %37 = dma.hbm_to_vmem [thread:$0]  %s30_s20, 4096, %s32_s22, [#allocation6], %s1069_s26, %s1069_s26, %s1070_s27  }
   0x7   :  { %s21_s29 = sshll.u32 %s1071_s28, 4  ;;  %s43_s7 = sshll.u32 %s1135_s2, 4  ;;  %s22_s29 = int_to_ptr.vmem [resolvable:$true] %s21_s29  ;;  %s44_s7 = int_to_ptr.hbm [resolvable:$true] %s43_s7 }
   0x8   :  { %24 = dma.hbm_to_vmem [thread:$0]  %s20_s25, 256, %s22_s29, [#allocation3]  }
   0x9   :  { %s53_s9 = sshll.u32 %s1136_s3, 4  ;;  %s1072_s10 = smov [#allocation7]   ;;  %s54_s9 = int_to_ptr.hbm [resolvable:$true] %s53_s9 }
   0xa   :  { %s45_s11 = sshll.u32 %s1072_s10, 4  ;;  %s1073_s0 = smov [#allocation8]   ;;  %s46_s11 = int_to_ptr.vmem [resolvable:$true] %s45_s11 }
   0xb   :  { %48 = dma.hbm_to_vmem [thread:$0]  %s44_s7, 32, %s46_s11, [#allocation6]  }
   0xc   :  { %s55_s12 = sshll.u32 %s1073_s0, 4  ;;  %s56_s12 = int_to_ptr.vmem [resolvable:$true] %s55_s12 }
   0xd   :  { %61 = dma.hbm_to_vmem [thread:$0]  %s54_s9, 4096, %s56_s12, [#allocation9], %s1069_s26, %s1069_s26, %s1070_s27  }
   0xe   :  { %1060 = dma.done.wait [#allocation3], 256  }
   0xf   :  { %1061 = vsyncadd [#allocation3], 4294967040 }
  0x10   :  { %1062 = dma.done.wait [#allocation6], 4128  }
  0x11   :  { %1063 = vsyncadd [#allocation6], 4294963168 }
  0x12   :  { %1064 = dma.done.wait [#allocation9], 4096  }
  0x13   :  { %1065 = vsyncadd [#allocation9], 4294963200  ;;  %v671_v0 = vld [vmem:[#allocation5 + $0x70] sm:$0xf]  ;;  %v884_v1 = vld [vmem:[#allocation5 + $0x74] sm:$0xf0] }
  0x14   :  { %v735_v2 = vld [vmem:[#allocation5 + $0xf0] sm:$0xf]  ;;  %v672_v3 = vor.u32 %v884_v1, %v671_v0  ;;  %v900_v4 = vld [vmem:[#allocation5 + $0xf4] sm:$0xf0]  ;;  %v883_v5 = vld [vmem:[#allocation5 + $0x74] sm:$0xf] }
  0x15   :  { %v673_v6 = vld [vmem:[#allocation5 + $0x78] sm:$0xf0]  ;;  %v736_v7 = vor.u32 %v900_v4, %v735_v2  ;;  %v899_v9 = vld [vmem:[#allocation5 + $0xf4] sm:$0xf]  ;;  %v663_v11 = vld [vmem:[#allocation5 + $0x60] sm:$0xf] }
  0x16   :  { %v676_v8 = vor.u32 %v883_v5, %v673_v6  ;;  %v737_v10 = vld [vmem:[#allocation5 + $0xf8] sm:$0xf0]  ;;  %282 = vmatpush.bf16.msra.mxu0 %v672_v3  ;;  %v882_v13 = vld [vmem:[#allocation5 + $0x64] sm:$0xf0]  ;;  %v727_v14 = vld [vmem:[#allocation5 + $0xe0] sm:$0xf] }
  0x17   :  { %v740_v12 = vor.u32 %v899_v9, %v737_v10  ;;  %v898_v15 = vld [vmem:[#allocation5 + $0xe4] sm:$0xf0]  ;;  %295 = vmatpush.bf16.msra.mxu1 %v736_v7  ;;  %v664_v16 = vor.u32 %v882_v13, %v663_v11  ;;  %v881_v18 = vld [vmem:[#allocation5 + $0x64] sm:$0xf]  ;;  %v665_v19 = vld [vmem:[#allocation5 + $0x68] sm:$0xf0] }
  0x18   :  { %308 = vmatpush.bf16.msra.mxu2 %v676_v8  ;;  %v728_v17 = vor.u32 %v898_v15, %v727_v14  ;;  %v897_v20 = vld [vmem:[#allocation5 + $0xe4] sm:$0xf]  ;;  %v668_v21 = vor.u32 %v881_v18, %v665_v19  ;;  %v729_v22 = vld [vmem:[#allocation5 + $0xe8] sm:$0xf0]  ;;  %v655_v23 = vld [vmem:[#allocation5 + $0x50] sm:$0xf] }
  0x19   :  { %321 = vmatpush.bf16.msra.mxu3 %v740_v12  ;;  %v880_v24 = vld [vmem:[#allocation5 + $0x54] sm:$0xf0]  ;;  %v732_v25 = vor.u32 %v897_v20, %v729_v22  ;;  %v719_v26 = vld [vmem:[#allocation5 + $0xd0] sm:$0xf]  ;;  %v879_v28 = vld [vmem:[#allocation5 + $0x54] sm:$0xf] }
  0x1a   :  { %v896_v27 = vld [vmem:[#allocation5 + $0xd4] sm:$0xf0]  ;;  %283 = vmatpush.bf16.msra.mxu0 %v664_v16  ;;  %v656_v29 = vor.u32 %v880_v24, %v655_v23  ;;  %v657_v30 = vld [vmem:[#allocation5 + $0x58] sm:$0xf0]  ;;  %v895_v31 = vld [vmem:[#allocation5 + $0xd4] sm:$0xf] }
  0x1b   :  { %v721_v32 = vld [vmem:[#allocation5 + $0xd8] sm:$0xf0]  ;;  %296 = vmatpush.bf16.msra.mxu1 %v728_v17  ;;  %v720_v33 = vor.u32 %v896_v27, %v719_v26  ;;  %v660_v34 = vor.u32 %v879_v28, %v657_v30  ;;  %v647_v35 = vld [vmem:[#allocation5 + $0x40] sm:$0xf]  ;;  %v878_v36 = vld [vmem:[#allocation5 + $0x44] sm:$0xf0] }
  0x1c   :  { %309 = vmatpush.bf16.msra.mxu2 %v668_v21  ;;  %v711_v37 = vld [vmem:[#allocation5 + $0xc0] sm:$0xf]  ;;  %v724_v38 = vor.u32 %v895_v31, %v721_v32  ;;  %v894_v39 = vld [vmem:[#allocation5 + $0xc4] sm:$0xf0]  ;;  %v877_v40 = vld [vmem:[#allocation5 + $0x44] sm:$0xf]  ;;  %v648_v44 = vor.u32 %v878_v36, %v647_v35 }
  0x1d   :  { %322 = vmatpush.bf16.msra.mxu3 %v732_v25  ;;  %v649_v41 = vld [vmem:[#allocation5 + $0x48] sm:$0xf0]  ;;  %v893_v42 = vld [vmem:[#allocation5 + $0xc4] sm:$0xf]  ;;  %v712_v45 = vor.u32 %v894_v39, %v711_v37  ;;  %v639_v47 = vld [vmem:[#allocation5 + $0x30] sm:$0xf] }
  0x1e   :  { %v713_v43 = vld [vmem:[#allocation5 + $0xc8] sm:$0xf0]  ;;  %284 = vmatpush.bf16.msra.mxu0 %v656_v29  ;;  %v652_v46 = vor.u32 %v877_v40, %v649_v41  ;;  %v876_v48 = vld [vmem:[#allocation5 + $0x34] sm:$0xf0]  ;;  %v703_v49 = vld [vmem:[#allocation5 + $0xb0] sm:$0xf] }
  0x1f   :  { %297 = vmatpush.bf16.msra.mxu1 %v720_v33  ;;  %v716_v50 = vor.u32 %v893_v42, %v713_v43  ;;  %v892_v51 = vld [vmem:[#allocation5 + $0xb4] sm:$0xf0]  ;;  %v875_v52 = vld [vmem:[#allocation5 + $0x34] sm:$0xf]  ;;  %v641_v53 = vld [vmem:[#allocation5 + $0x38] sm:$0xf0]  ;;  %v640_v56 = vor.u32 %v876_v48, %v639_v47 }
  0x20   :  { %310 = vmatpush.bf16.msra.mxu2 %v660_v34  ;;  %v891_v54 = vld [vmem:[#allocation5 + $0xb4] sm:$0xf]  ;;  %v705_v55 = vld [vmem:[#allocation5 + $0xb8] sm:$0xf0]  ;;  %v704_v57 = vor.u32 %v892_v51, %v703_v49  ;;  %v644_v58 = vor.u32 %v875_v52, %v641_v53  ;;  %v631_v59 = vld [vmem:[#allocation5 + $0x20] sm:$0xf] }
  0x21   :  { %323 = vmatpush.bf16.msra.mxu3 %v724_v38  ;;  %v874_v60 = vld [vmem:[#allocation5 + $0x24] sm:$0xf0]  ;;  %v695_v61 = vld [vmem:[#allocation5 + $0xa0] sm:$0xf]  ;;  %v708_v62 = vor.u32 %v891_v54, %v705_v55  ;;  %v873_v0 = vld [vmem:[#allocation5 + $0x24] sm:$0xf] }
  0x22   :  { %285 = vmatpush.bf16.msra.mxu0 %v648_v44  ;;  %v890_v63 = vld [vmem:[#allocation5 + $0xa4] sm:$0xf0]  ;;  %v633_v1 = vld [vmem:[#allocation5 + $0x28] sm:$0xf0]  ;;  %v889_v2 = vld [vmem:[#allocation5 + $0xa4] sm:$0xf]  ;;  %v632_v4 = vor.u32 %v874_v60, %v631_v59 }
  0x23   :  { %298 = vmatpush.bf16.msra.mxu1 %v712_v45  ;;  %v697_v3 = vld [vmem:[#allocation5 + $0xa8] sm:$0xf0]  ;;  %v696_v5 = vor.u32 %v890_v63, %v695_v61  ;;  %v636_v6 = vor.u32 %v873_v0, %v633_v1  ;;  %v623_v7 = vld [vmem:[#allocation5 + $0x10] sm:$0xf]  ;;  %v872_v8 = vld [vmem:[#allocation5 + $0x14] sm:$0xf0] }
  0x24   :  { %311 = vmatpush.bf16.msra.mxu2 %v652_v46  ;;  %v687_v9 = vld [vmem:[#allocation5 + $0x90] sm:$0xf]  ;;  %v700_v10 = vor.u32 %v889_v2, %v697_v3  ;;  %v888_v11 = vld [vmem:[#allocation5 + $0x94] sm:$0xf0]  ;;  %v871_v12 = vld [vmem:[#allocation5 + $0x14] sm:$0xf]  ;;  %v624_v16 = vor.u32 %v872_v8, %v623_v7 }
  0x25   :  { %324 = vmatpush.bf16.msra.mxu3 %v716_v50  ;;  %v625_v13 = vld [vmem:[#allocation5 + $0x18] sm:$0xf0]  ;;  %v887_v14 = vld [vmem:[#allocation5 + $0x94] sm:$0xf]  ;;  %v615_v17 = vld [vmem:[#allocation5] sm:$0xf]  ;;  %v688_v18 = vor.u32 %v888_v11, %v687_v9 }
  0x26   :  { %286 = vmatpush.bf16.msra.mxu0 %v640_v56  ;;  %v689_v15 = vld [vmem:[#allocation5 + $0x98] sm:$0xf0]  ;;  %v628_v19 = vor.u32 %v871_v12, %v625_v13  ;;  %v870_v20 = vld [vmem:[#allocation5 + $0x4] sm:$0xf0]  ;;  %v679_v21 = vld [vmem:[#allocation5 + $0x80] sm:$0xf] }
  0x27   :  { %299 = vmatpush.bf16.msra.mxu1 %v704_v57  ;;  %v886_v22 = vld [vmem:[#allocation5 + $0x84] sm:$0xf0]  ;;  %v692_v23 = vor.u32 %v887_v14, %v689_v15  ;;  %v869_v24 = vld [vmem:[#allocation5 + $0x4] sm:$0xf]  ;;  %v617_v25 = vld [vmem:[#allocation5 + $0x8] sm:$0xf0]  ;;  %v616_v30 = vor.u32 %v870_v20, %v615_v17 }
  0x28   :  { %312 = vmatpush.bf16.msra.mxu2 %v644_v58  ;;  %v885_v26 = vld [vmem:[#allocation5 + $0x84] sm:$0xf]  ;;  %v681_v27 = vld [vmem:[#allocation5 + $0x88] sm:$0xf0]  ;;  %v799_v28 = vld [vmem:[#allocation8 + $0x70] sm:$0xf]  ;;  %v680_v34 = vor.u32 %v886_v22, %v679_v21  ;;  %v620_v35 = vor.u32 %v869_v24, %v617_v25 }
  0x29   :  { %325 = vmatpush.bf16.msra.mxu3 %v708_v62  ;;  %v916_v29 = vld [vmem:[#allocation8 + $0x74] sm:$0xf0]  ;;  %v1117_v31 = vld [vmem:[#allocation2] sm:$0xff]  ;;  %v801_v33 = vld [vmem:[#allocation8 + $0x78] sm:$0xf0]  ;;  %v684_v37 = vor.u32 %v885_v26, %v681_v27  ;;  %s1074_s13 = smov [#allocation10]  }
  0x2a   :  { %287 = vmatpush.bf16.msra.mxu0 %v632_v4  ;;  %v915_v32 = vld [vmem:[#allocation8 + $0x74] sm:$0xf]  ;;  %v800_v38 = vor.u32 %v916_v29, %v799_v28  ;;  %v791_v39 = vld [vmem:[#allocation8 + $0x60] sm:$0xf]  ;;  %v863_v40 = vld [vmem:[#allocation8 + $0xf0] sm:$0xf]  ;;  %v82_v42 = vpack.c.bf16 %v1117_v31, %v1117_v31 }
  0x2b   :  { %300 = vmatpush.bf16.msra.mxu1 %v696_v5  ;;  %v1119_v36 = vld [vmem:[#allocation2 + $0x8] sm:$0xff]  ;;  %v804_v43 = vor.u32 %v915_v32, %v801_v33  ;;  %v914_v44 = vld [vmem:[#allocation8 + $0x64] sm:$0xf0]  ;;  %v913_v48 = vld [vmem:[#allocation8 + $0x64] sm:$0xf]  ;;  %s599_s14 = sshll.u32 %s1074_s13, 4  ;;  %s600_s14 = int_to_ptr.vmem [resolvable:$true] %s599_s14 }
  0x2c   :  { %313 = vmatpush.bf16.msra.mxu2 %v636_v6  ;;  %v932_v41 = vld [vmem:[#allocation8 + $0xf4] sm:$0xf0]  ;;  %v931_v45 = vld [vmem:[#allocation8 + $0xf4] sm:$0xf]  ;;  %v865_v46 = vld [vmem:[#allocation8 + $0xf8] sm:$0xf0]  ;;  %v83_v47 = vpack.c.bf16 %v1119_v36, %v1119_v36  ;;  %v792_v51 = vor.u32 %v914_v44, %v791_v39 }
  0x2d   :  { %326 = vmatpush.bf16.msra.mxu3 %v700_v10  ;;  %v793_v49 = vld [vmem:[#allocation8 + $0x68] sm:$0xf0]  ;;  %v864_v50 = vor.u32 %v932_v41, %v863_v40  ;;  %v868_v52 = vor.u32 %v931_v45, %v865_v46  ;;  %v783_v53 = vld [vmem:[#allocation8 + $0x50] sm:$0xf]  ;;  %v855_v54 = vld [vmem:[#allocation8 + $0xe0] sm:$0xf] }
  0x2e   :  { %288 = vmatpush.bf16.msra.mxu0 %v624_v16  ;;  %v930_v55 = vld [vmem:[#allocation8 + $0xe4] sm:$0xf0]  ;;  %v796_v56 = vor.u32 %v913_v48, %v793_v49  ;;  %v912_v57 = vld [vmem:[#allocation8 + $0x54] sm:$0xf0]  ;;  %v929_v58 = vld [vmem:[#allocation8 + $0xe4] sm:$0xf] }
  0x2f   :  { %301 = vmatpush.bf16.msra.mxu1 %v688_v18  ;;  %v857_v59 = vld [vmem:[#allocation8 + $0xe8] sm:$0xf0]  ;;  %v911_v60 = vld [vmem:[#allocation8 + $0x54] sm:$0xf]  ;;  %v785_v61 = vld [vmem:[#allocation8 + $0x58] sm:$0xf0]  ;;  %v856_v62 = vor.u32 %v930_v55, %v855_v54  ;;  %v784_v63 = vor.u32 %v912_v57, %v783_v53 }
  0x30   :  { %314 = vmatpush.bf16.msra.mxu2 %v628_v19  ;;  %v860_v0 = vor.u32 %v929_v58, %v857_v59  ;;  %v775_v1 = vld [vmem:[#allocation8 + $0x40] sm:$0xf]  ;;  %v847_v2 = vld [vmem:[#allocation8 + $0xd0] sm:$0xf]  ;;  %v928_v3 = vld [vmem:[#allocation8 + $0xd4] sm:$0xf0]  ;;  %v788_v4 = vor.u32 %v911_v60, %v785_v61 }
  0x31   :  { %327 = vmatpush.bf16.msra.mxu3 %v692_v23  ;;  %v910_v5 = vld [vmem:[#allocation8 + $0x44] sm:$0xf0]  ;;  %v927_v6 = vld [vmem:[#allocation8 + $0xd4] sm:$0xf]  ;;  %v849_v7 = vld [vmem:[#allocation8 + $0xd8] sm:$0xf0]  ;;  %v848_v10 = vor.u32 %v928_v3, %v847_v2 }
  0x32   :  { %289 = vmatpush.bf16.msra.mxu0 %v616_v30  ;;  %v909_v8 = vld [vmem:[#allocation8 + $0x44] sm:$0xf]  ;;  %v777_v9 = vld [vmem:[#allocation8 + $0x48] sm:$0xf0]  ;;  %v776_v11 = vor.u32 %v910_v5, %v775_v1  ;;  %v852_v12 = vor.u32 %v927_v6, %v849_v7  ;;  %v767_v13 = vld [vmem:[#allocation8 + $0x30] sm:$0xf] }
  0x33   :  { %302 = vmatpush.bf16.msra.mxu1 %v680_v34  ;;  %v839_v14 = vld [vmem:[#allocation8 + $0xc0] sm:$0xf]  ;;  %v926_v15 = vld [vmem:[#allocation8 + $0xc4] sm:$0xf0]  ;;  %v780_v16 = vor.u32 %v909_v8, %v777_v9  ;;  %v908_v17 = vld [vmem:[#allocation8 + $0x34] sm:$0xf0] }
  0x34   :  { %315 = vmatpush.bf16.msra.mxu2 %v620_v35  ;;  %v925_v18 = vld [vmem:[#allocation8 + $0xc4] sm:$0xf]  ;;  %v841_v19 = vld [vmem:[#allocation8 + $0xc8] sm:$0xf0]  ;;  %v907_v20 = vld [vmem:[#allocation8 + $0x34] sm:$0xf]  ;;  %v840_v22 = vor.u32 %v926_v15, %v839_v14  ;;  %v768_v23 = vor.u32 %v908_v17, %v767_v13 }
  0x35   :  { %328 = vmatpush.bf16.msra.mxu3 %v684_v37  ;;  %290 = vmatmul.bf16.vlgmr.msra.gmra.mxu0 %v82_v42  ;;  %v769_v21 = vld [vmem:[#allocation8 + $0x38] sm:$0xf0]  ;;  %v844_v24 = vor.u32 %v925_v18, %v841_v19  ;;  %v759_v26 = vld [vmem:[#allocation8 + $0x20] sm:$0xf]  ;;  %v906_v27 = vld [vmem:[#allocation8 + $0x24] sm:$0xf0] }
  0x36   :  { %536 = vmatpush.bf16.msrb.mxu0 %v800_v38  ;;  %303 = vmatmul.bf16.vlgmr.msra.gmra.mxu1 %v83_v47  ;;  %v772_v25 = vor.u32 %v907_v20, %v769_v21  ;;  %v905_v28 = vld [vmem:[#allocation8 + $0x24] sm:$0xf]  ;;  %v761_v29 = vld [vmem:[#allocation8 + $0x28] sm:$0xf0]  ;;  %v760_v30 = vor.u32 %v906_v27, %v759_v26  ;;  %v831_v33 = vld [vmem:[#allocation8 + $0xb0] sm:$0xf] }
  0x37   :  { %316 = vmatmul.bf16.vlgmr.msra.gmra.mxu2 %v82_v42  ;;  %549 = vmatpush.bf16.msrb.mxu1 %v864_v50  ;;  %v764_v32 = vor.u32 %v905_v28, %v761_v29  ;;  %v924_v34 = vld [vmem:[#allocation8 + $0xb4] sm:$0xf0]  ;;  %v923_v35 = vld [vmem:[#allocation8 + $0xb4] sm:$0xf]  ;;  %v833_v38 = vld [vmem:[#allocation8 + $0xb8] sm:$0xf0] }
  0x38   :  { %562 = vmatpush.bf16.msrb.mxu2 %v804_v43  ;;  %329 = vmatmul.bf16.vlgmr.msra.gmra.mxu3 %v83_v47  ;;  %v832_v37 = vor.u32 %v924_v34, %v831_v33  ;;  %v836_v39 = vor.u32 %v923_v35, %v833_v38  ;;  %v751_v40 = vld [vmem:[#allocation8 + $0x10] sm:$0xf]  ;;  %v904_v41 = vld [vmem:[#allocation8 + $0x14] sm:$0xf0]  ;;  %v903_v42 = vld [vmem:[#allocation8 + $0x14] sm:$0xf] }
  0x39   :  { %575 = vmatpush.bf16.msrb.mxu3 %v868_v52  ;;  %v752_v43 = vor.u32 %v904_v41, %v751_v40  ;;  %v753_v44 = vld [vmem:[#allocation8 + $0x18] sm:$0xf0]  ;;  %v823_v46 = vld [vmem:[#allocation8 + $0xa0] sm:$0xf]  ;;  %v922_v47 = vld [vmem:[#allocation8 + $0xa4] sm:$0xf0] }
  0x3a   :  { %537 = vmatpush.bf16.msrb.mxu0 %v792_v51  ;;  %v756_v45 = vor.u32 %v903_v42, %v753_v44  ;;  %v921_v48 = vld [vmem:[#allocation8 + $0xa4] sm:$0xf]  ;;  %v824_v49 = vor.u32 %v922_v47, %v823_v46  ;;  %v825_v50 = vld [vmem:[#allocation8 + $0xa8] sm:$0xf0]  ;;  %v743_v52 = vld [vmem:[#allocation8] sm:$0xf] }
  0x3b   :  { %550 = vmatpush.bf16.msrb.mxu1 %v856_v62  ;;  %v828_v51 = vor.u32 %v921_v48, %v825_v50  ;;  %v902_v53 = vld [vmem:[#allocation8 + $0x4] sm:$0xf0]  ;;  %v901_v54 = vld [vmem:[#allocation8 + $0x4] sm:$0xf]  ;;  %v815_v58 = vld [vmem:[#allocation8 + $0x90] sm:$0xf] }
  0x3c   :  { %563 = vmatpush.bf16.msrb.mxu2 %v796_v56  ;;  %v744_v55 = vor.u32 %v902_v53, %v743_v52  ;;  %v745_v56 = vld [vmem:[#allocation8 + $0x8] sm:$0xf0]  ;;  %v920_v59 = vld [vmem:[#allocation8 + $0x94] sm:$0xf0]  ;;  %v919_v61 = vld [vmem:[#allocation8 + $0x94] sm:$0xf] }
  0x3d   :  { %576 = vmatpush.bf16.msrb.mxu3 %v860_v0  ;;  %v748_v57 = vor.u32 %v901_v54, %v745_v56  ;;  %v816_v60 = vor.u32 %v920_v59, %v815_v58  ;;  %v817_v62 = vld [vmem:[#allocation8 + $0x98] sm:$0xf0]  ;;  %v807_v0 = vld [vmem:[#allocation8 + $0x80] sm:$0xf]  ;;  %v918_v1 = vld [vmem:[#allocation8 + $0x84] sm:$0xf0] }
  0x3e   :  { %538 = vmatpush.bf16.msrb.mxu0 %v784_v63  ;;  %v820_v63 = vor.u32 %v919_v61, %v817_v62  ;;  %v917_v2 = vld [vmem:[#allocation8 + $0x84] sm:$0xf]  ;;  %v808_v3 = vor.u32 %v918_v1, %v807_v0  ;;  %v116_v6 = vld [vmem:[#allocation7] sm:$0x3]  ;;  %s601_s16 = sshll.u32 %s1138_s5, 4  ;;  %s602_s16 = int_to_ptr.hbm [resolvable:$true] %s601_s16 }
  0x3f   :  { %551 = vmatpush.bf16.msrb.mxu1 %v848_v10  ;;  %v118_v7 = vperm.slane %v116_v6, 0 }
  0x40   :  { %564 = vmatpush.bf16.msrb.mxu2 %v788_v4  ;;  %v809_v4 = vld [vmem:[#allocation8 + $0x88] sm:$0xf0] }
  0x41   :  { %577 = vmatpush.bf16.msrb.mxu3 %v852_v12  ;;  %v812_v5 = vor.u32 %v917_v2, %v809_v4  ;;  %v119_v12 = vperm.slane %v116_v6, 1 }
  0x42   :  { %539 = vmatpush.bf16.msrb.mxu0 %v776_v11 }
  0x43   :  { %552 = vmatpush.bf16.msrb.mxu1 %v840_v22 }
  0x44   :  { %565 = vmatpush.bf16.msrb.mxu2 %v780_v16 }
  0x45   :  { %578 = vmatpush.bf16.msrb.mxu3 %v844_v24 }
  0x46   :  { %540 = vmatpush.bf16.msrb.mxu0 %v768_v23 }
  0x47   :  { %553 = vmatpush.bf16.msrb.mxu1 %v832_v37 }
  0x48   :  { %566 = vmatpush.bf16.msrb.mxu2 %v772_v25  ;;  %v370_v25 = vld [vmem:[%s1137_s4] sm:$0x3] }
  0x49   :  { %579 = vmatpush.bf16.msrb.mxu3 %v836_v39  ;;  %v372_v26 = vperm.slane %v370_v25, 0  ;;  %v373_v29 = vperm.slane %v370_v25, 1 }
  0x4a   :  { %541 = vmatpush.bf16.msrb.mxu0 %v760_v30 }
  0x4b   :  { %554 = vmatpush.bf16.msrb.mxu1 %v824_v49 }
  0x4c   :  { %567 = vmatpush.bf16.msrb.mxu2 %v764_v32 }
  0x4d   :  { %580 = vmatpush.bf16.msrb.mxu3 %v828_v51 }
  0x4e   :  { %542 = vmatpush.bf16.msrb.mxu0 %v752_v43 }
  0x4f   :  { %555 = vmatpush.bf16.msrb.mxu1 %v816_v60 }
  0x50   :  { %568 = vmatpush.bf16.msrb.mxu2 %v756_v45 }
  0x51   :  { %581 = vmatpush.bf16.msrb.mxu3 %v820_v63 }
  0x52   :  { %543 = vmatpush.bf16.msrb.mxu0 %v744_v55 }
  0x53   :  { %556 = vmatpush.bf16.msrb.mxu1 %v808_v3 }
  0x54   :  { %569 = vmatpush.bf16.msrb.mxu2 %v748_v57 }
  0x55   :  { %582 = vmatpush.bf16.msrb.mxu3 %v812_v5 }
  0xb2   :  { %v291_v8 = vpop.f32.mrf.mxu0 }
  0xb3   :  { %v292_v9 = vadd.f32 %v291_v8, %v118_v7  ;;  %v304_v10 = vpop.f32.mrf.mxu1 }
  0xb5   :  { %v305_v11 = vadd.f32 %v304_v10, %v292_v9 }
  0xb7   :  { %v334_v13 = vmax.f32 %v305_v11, 0.0 }
  0xb9   :  { %v336_v14 = vpack.c.bf16 %v334_v13, %v334_v13 }
  0xba   :  { %v317_v15 = vpop.f32.mrf.mxu2  ;;  %v293_v18 = vpop.f32.mrf.mxu0 }
  0xbb   :  { %v318_v16 = vadd.f32 %v317_v15, %v119_v12  ;;  %v330_v17 = vpop.f32.mrf.mxu3  ;;  %v306_v19 = vpop.f32.mrf.mxu1  ;;  %544 = vmatmul.bf16.vlgmr.msrb.gmra.mxu0 %v336_v14  ;;  %570 = vmatmul.bf16.vlgmr.msrb.gmra.mxu2 %v336_v14 }
  0xbd   :  { %v331_v20 = vadd.f32 %v330_v17, %v318_v16 }
  0xbf   :  { %v335_v21 = vmax.f32 %v331_v20, 0.0 }
  0xc1   :  { %v337_v22 = vpack.c.bf16 %v335_v21, %v335_v21 }
  0xc2   :  { %v319_v23 = vpop.f32.mrf.mxu2 }
  0xc3   :  { %v332_v24 = vpop.f32.mrf.mxu3  ;;  %557 = vmatmul.bf16.vlgmr.msrb.gmra.mxu1 %v337_v22  ;;  %583 = vmatmul.bf16.vlgmr.msrb.gmra.mxu3 %v337_v22 }
 0x138   :  { %v545_v27 = vpop.f32.mrf.mxu0 }
 0x139   :  { %v546_v28 = vadd.f32 %v545_v27, %v372_v26 }
 0x13e   :  { %v571_v30 = vpop.f32.mrf.mxu2 }
 0x13f   :  { %v572_v37 = vadd.f32 %v571_v30, %v373_v29 }
 0x140   :  { %v558_v32 = vpop.f32.mrf.mxu1  ;;  %v547_v34 = vpop.f32.mrf.mxu0 }
 0x141   :  { %v559_v33 = vadd.f32 %v558_v32, %v546_v28 }
 0x143   :  { %v588_v35 = vmax.f32 %v559_v33, 0.0 }
 0x145   :  { %v590_v38 = vadd.f32 %v588_v35, %v1117_v31 }
 0x146   :  { %v584_v39 = vpop.f32.mrf.mxu3  ;;  %v573_v41 = vpop.f32.mrf.mxu2 }
 0x147   :  { %592 = vst [vmem:[#allocation10] sm:$0xff] %v590_v38  ;;  %v585_v40 = vadd.f32 %v584_v39, %v572_v37 }
 0x148   :  { %v560_v42 = vpop.f32.mrf.mxu1 }
 0x149   :  { %v589_v43 = vmax.f32 %v585_v40, 0.0 }
 0x14b   :  { %v591_v44 = vadd.f32 %v589_v43, %v1119_v36 }
 0x14d   :  { %593 = vst [vmem:[#allocation10 + $0x8] sm:$0xff] %v591_v44 }
 0x14e   :  { %v586_v45 = vpop.f32.mrf.mxu3  ;;  %604 = dma.vmem_to_hbm [thread:$0]  %s600_s14, 256, %s602_s16, [#allocation4]  }
 0x14f   :  { %1066 = dma.done.wait [#allocation4], 256  }
 0x150   :  { %1067 = vsyncadd [#allocation4], 4294967040 }
 0x151   :  { %609 = vsyncpa [#allocation3], 1 }
 0x152   :  { %610 = vsyncpa [#allocation6], 1 }
 0x153   :  { %611 = vsyncpa [#allocation9], 1 }
 0x154   :  { %612 = vsyncpa [#allocation4], 1 }

</bundles_post_ra>
